<compile_context>
chip_gen: v5e
topology: v5e:2x2
jax: 0.10.0
libtpu: 0.0.40
codegen_flags: <defaults>
</compile_context>

<pallas_src>
import math

import jax
import jax.numpy as jnp
from jax.experimental import pallas as pl
from jax.experimental.pallas import tpu as pltpu


def make_positional_encoding(d_model: int, max_len: int = 10) -> jnp.ndarray:
    """Exact reproduction of the PyTorch __init__ table, shape (max_len, d_model), f32."""
    position = jnp.arange(0, max_len, dtype=jnp.float32)[:, None]              # (max_len, 1)
    div_term = jnp.exp(
        jnp.arange(0, d_model, 2, dtype=jnp.float32) * -(math.log(10000.0) / d_model)
    )                                                                           # (ceil(d/2),)
    angles = position * div_term                                                # (max_len, ceil(d/2))
    enc = jnp.zeros((max_len, d_model), dtype=jnp.float32)
    enc = enc.at[:, 0::2].set(jnp.sin(angles))
    enc = enc.at[:, 1::2].set(jnp.cos(angles)[:, : d_model // 2])
    return enc


def _pe_add_kernel(x_ref, pe_ref, o_ref):
    # x_ref/o_ref: (TB, TC) tile of the flattened (B, S*D) view.
    # pe_ref: (1, TC) column slice of the table, broadcast over the row axis.
    # Add in f32, cast to the output dtype (matches f32 reference exactly for
    # f32 activations; minimizes rounding for bf16 activations).
    o_ref[...] = (x_ref[...].astype(jnp.float32) + pe_ref[...]).astype(o_ref.dtype)


def _vmem_budget():
    """(target block bytes, scoped VMEM limit) per TPU generation."""
    try:
        cap = int(pltpu.get_tpu_info().vmem_capacity_bytes)
    except Exception:
        cap = 128 << 20
    if cap <= (64 << 20):
        # v7x-class: 64 MiB physical per TC — keep ~4 MiB blocks (≈18 MiB live).
        return 4 << 20, 32 << 20
    # v5e/v6e: 128 MiB physical — ~8 MiB blocks (≈34 MiB live), raise scoped limit.
    return 8 << 20, 64 << 20


def _sublane_granularity(itemsize: int) -> int:
    # f32 -> 8, bf16/f16 -> 16, int8/fp8 -> 32 (packed sublane granularity).
    return max(8, 32 // max(itemsize, 1))


def _choose_tiles(B: int, SD: int, itemsize: int, target_bytes: int, sub_gran: int):
    """Pick (row_tile, col_tile) for the flattened (B, S*D) view.

    Blocks stay <= target_bytes; row tile is a multiple of the sublane
    granularity (or covers B); column tile is a multiple of 128 lanes (or SD).
    """
    lane = 128
    total_bytes = B * SD * itemsize

    if total_bytes <= target_bytes:
        tb, tc = B, SD
    elif SD * itemsize * sub_gran <= target_bytes:
        # Full rows fit at sublane granularity: stream over batch rows only.
        tc = SD
        rows = (target_bytes // (SD * itemsize)) // sub_gran * sub_gran
        tb = min(B, max(sub_gran, rows))
    else:
        # A sublane-granularity slab of full rows is too big: tile columns too.
        tb = min(B, sub_gran)
        per_row_bytes = target_bytes // max(tb, 1)
        tc = min(SD, max(lane, (per_row_bytes // itemsize) // lane * lane))

    # If the grid degenerates to very few steps on a non-trivial input, split
    # columns so DMA-in / compute / DMA-out overlap and both v7x TCs get work.
    steps = pl.cdiv(B, tb) * pl.cdiv(SD, tc)
    if steps < 4 and total_bytes >= (4 << 20) and tc > lane:
        ncol = min(pl.cdiv(4, pl.cdiv(B, tb)), tc // lane)
        tc = pl.cdiv(tc // lane, ncol) * lane

    return tb, tc


def positional_encoding_forward(
    x: jnp.ndarray, encoding: jnp.ndarray, *, force_pallas: bool = False
) -> jnp.ndarray:
    """x: (B, S, D); encoding: (max_len, D) f32. Returns x + encoding[:S] broadcast over batch.

    Output dtype matches x.dtype (the add is computed in f32 internally).
    """
    B, S, D = x.shape
    max_len, d_enc = encoding.shape
    if S > max_len:
        raise ValueError(f"seq_len={S} exceeds max_len={max_len} of positional encoding")
    if d_enc != D:
        raise ValueError(f"d_model mismatch: x has {D}, encoding has {d_enc}")

    SD = S * D
    itemsize = jnp.dtype(x.dtype).itemsize
    total_bytes = B * SD * itemsize

    # Tiny inputs (kernel launch dwarfs the add) or lane-misaligned S*D
    # (masked tail stores): let XLA fuse the broadcast-add for free.
    if (SD % 128 != 0) or (total_bytes < (1 << 20) and not force_pallas):
        return (x.astype(jnp.float32) + encoding[None, :S, :]).astype(x.dtype)

    target_bytes, vmem_limit = _vmem_budget()
    sub_gran = _sublane_granularity(itemsize)
    tb, tc = _choose_tiles(B, SD, itemsize, target_bytes, sub_gran)

    # Flatten so the last dim is S*D (multiple of 128) -> lane-dense stores.
    x2 = x.reshape(B, SD)
    pe2 = encoding[:S, :].astype(jnp.float32).reshape(1, SD)

    grid = (pl.cdiv(B, tb), pl.cdiv(SD, tc))

    cost = pl.CostEstimate(
        flops=B * SD,
        transcendentals=0,
        bytes_accessed=2 * B * SD * itemsize + SD * 4,
    )

    out2 = pl.pallas_call(
        _pe_add_kernel,
        out_shape=jax.ShapeDtypeStruct((B, SD), x.dtype),
        grid_spec=pl.GridSpec(
            grid=grid,
            in_specs=[
                pl.BlockSpec((tb, tc), lambda i, j: (i, j)),   # x tile
                pl.BlockSpec((1, tc), lambda i, j: (0, j)),    # pe column slice (tiny)
            ],
            out_specs=pl.BlockSpec((tb, tc), lambda i, j: (i, j)),
        ),
        compiler_params=pltpu.CompilerParams(
            dimension_semantics=("parallel", "parallel"),      # megacore sharding on v7x
            vmem_limit_bytes=vmem_limit,
        ),
        cost_estimate=cost,
    )(x2, pe2)

    return out2.reshape(B, S, D)


if __name__ == "__main__":
    # Small shapes consistent with the module: d_model=32, max_len=10, seq=8, batch=2
    B, S, D = 2, 8, 32
    max_len = 10

    key = jax.random.PRNGKey(0)
    x = jax.random.normal(key, (B, S, D), dtype=jnp.float32)

    encoding = make_positional_encoding(D, max_len)

    # force_pallas=True so the demo exercises the Pallas kernel even though the
    # input is below the normal plain-JAX early-exit threshold.
    out = positional_encoding_forward(x, encoding, force_pallas=True)
    out = jax.block_until_ready(out)

    # Reference check (pure JAX)
    ref = x + encoding[None, :S, :]
    assert out.shape == (B, S, D)
    assert jnp.allclose(out, ref, atol=1e-6), "mismatch vs reference"

    print("KERNEL_OK")
</pallas_src>

<mosaic_0001>
module attributes {stable_mosaic.version = 11 : i64} {
  func.func @_pe_add_kernel(%arg0: i32, %arg1: i32, %arg2: memref<2x256xf32, #tpu.memory_space<vmem>>, %arg3: memref<1x256xf32, #tpu.memory_space<vmem>>, %arg4: memref<2x256xf32, #tpu.memory_space<vmem>>) attributes {dimension_semantics = [#tpu.dimension_semantics<parallel>, #tpu.dimension_semantics<parallel>], iteration_bounds = array<i64: 1, 1>, scalar_prefetch = 0 : i64, scratch_operands = 0 : i64, tpu.core_type = #tpu.core_type<tc>, window_params = [{transform_indices = @transform_0, window_bounds = array<i64: 2, 256>}, {transform_indices = @transform_1, window_bounds = array<i64: 1, 256>}, {transform_indices = @transform_2, window_bounds = array<i64: 2, 256>}]} {
    %c0 = arith.constant 0 : index
    %c0_0 = arith.constant 0 : index
    %0 = vector.load %arg2[%c0, %c0_0] : memref<2x256xf32, #tpu.memory_space<vmem>>, vector<2x256xf32>
    %c0_1 = arith.constant 0 : index
    %c0_2 = arith.constant 0 : index
    %1 = vector.load %arg3[%c0_1, %c0_2] : memref<1x256xf32, #tpu.memory_space<vmem>>, vector<1x256xf32>
    %2 = vector.broadcast %1 : vector<1x256xf32> to vector<2x256xf32>
    %3 = arith.addf %0, %2 : vector<2x256xf32>
    %c0_3 = arith.constant 0 : index
    %c0_4 = arith.constant 0 : index
    %4 = vector.load %arg4[%c0_3, %c0_4] : memref<2x256xf32, #tpu.memory_space<vmem>>, vector<2x256xf32>
    tpu.vector_store %arg4[%c0_3, %c0_4], %3 {strides = array<i32>} : memref<2x256xf32, #tpu.memory_space<vmem>>, vector<2x256xf32>,
    return
  }
  func.func @transform_0(%arg0: i32, %arg1: i32) -> (i32, i32) {
    %c0_i32 = arith.constant 0 : i32
    return %arg0, %arg1 : i32, i32
  }
  func.func @transform_1(%arg0: i32, %arg1: i32) -> (i32, i32) {
    %c0_i32 = arith.constant 0 : i32
    %c0_i32_0 = arith.constant 0 : i32
    return %c0_i32, %arg1 : i32, i32
  }
  func.func @transform_2(%arg0: i32, %arg1: i32) -> (i32, i32) {
    %c0_i32 = arith.constant 0 : i32
    return %arg0, %arg1 : i32, i32
  }
}

</mosaic_0001>

<bundles_post_ra>
// kernel: tpu_custom_call.1
= control target key start
LH: loop header
LB: loop body
LE: loop exit
PB: predicated region body
PF: predicated region fallthrough
CT: control target
= control target key end

     0   :  { %7 = vsyncpa [#allocation3], 0  ;;  %s177_s0 = inlined_call_operand.hbm [shape: f32[2,256], index: 0, kind: input, shape index: {}]   ;;  %s178_s1 = inlined_call_operand.hbm [shape: f32[1,256], index: 1, kind: input, shape index: {}]   ;;  %s179_s2 = inlined_call_operand.hbm [shape: f32[2,256], index: 2, kind: output, shape index: {}]  }
   0x1   :  { %8 = vsyncpa [#allocation6], 0 }
   0x2   :  { %9 = vsyncpa [#allocation4], 0  ;;  %s15_s11 = sshll.u32 %s177_s0, 4  ;;  %s150_s12 = smov [#allocation2]   ;;  %s16_s11 = int_to_ptr.hbm [resolvable:$true] %s15_s11 }
   0x3   :  { %s17_s13 = sshll.u32 %s150_s12, 4  ;;  %s26_s16 = sshll.u32 %s178_s1, 4  ;;  %s18_s13 = int_to_ptr.vmem [resolvable:$true] %s17_s13  ;;  %s27_s16 = int_to_ptr.hbm [resolvable:$true] %s26_s16 }
   0x4   :  { %20 = dma.hbm_to_vmem [thread:$0]  %s16_s11, 64, %s18_s13, [#allocation3]  }
   0x5   :  { %s151_s17 = smov [#allocation5]  }
   0x6   :  { %s28_s18 = sshll.u32 %s151_s17, 4  ;;  %s29_s18 = int_to_ptr.vmem [resolvable:$true] %s28_s18 }
   0x7   :  { %31 = dma.hbm_to_vmem [thread:$0]  %s27_s16, 32, %s29_s18, [#allocation6]  }
   0x8   :  { %144 = dma.done.wait [#allocation3], 64  }
   0x9   :  { %145 = vsyncadd [#allocation3], 4294967232 }
   0xa   :  { %146 = dma.done.wait [#allocation6], 32  }
   0xb   :  { %147 = vsyncadd [#allocation6], 4294967264  ;;  %v41_v0 = vld [vmem:[#allocation5] sm:$0x3]  ;;  %vm46_vm0 = vcmask 1041408   ;;  %s152_s0 = smov [#allocation7]  }
   0xc   :  { %v43_v1 = vperm.slane %v41_v0, 0  ;;  %v44_v2 = vperm.slane %v41_v0, 1  ;;  %v40_v3 = vld [vmem:[#allocation2] sm:$0xf]  ;;  %s56_s19 = sshll.u32 %s152_s0, 4  ;;  %s58_s21 = sshll.u32 %s179_s2, 4  ;;  %s57_s19 = int_to_ptr.vmem [resolvable:$true] %s56_s19  ;;  %s59_s21 = int_to_ptr.hbm [resolvable:$true] %s58_s21 }
   0xe   :  { %v45_v4 = vrot.slane %v44_v2, 6 }
  0x10   :  { %v47_v5 = vsel %vm46_vm0, %v43_v1, %v45_v4 }
  0x11   :  { %v49_v6 = vadd.f32 %v47_v5, %v40_v3 }
  0x13   :  { %50 = vst [vmem:[#allocation7] sm:$0xf] %v49_v6 }
  0x14   :  { %61 = dma.vmem_to_hbm [thread:$0]  %s57_s19, 64, %s59_s21, [#allocation4]  }
  0x15   :  { %148 = dma.done.wait [#allocation4], 64  }
  0x16   :  { %149 = vsyncadd [#allocation4], 4294967232 }
  0x17   :  { %66 = vsyncpa [#allocation3], 1 }
  0x18   :  { %67 = vsyncpa [#allocation6], 1 }
  0x19   :  { %68 = vsyncpa [#allocation4], 1 }

</bundles_post_ra>
